<compile_context>
chip_gen: v7x
topology: tpu7x:2x2x1
jax: 0.10.0
libtpu: 0.0.40
codegen_flags: <defaults>
</compile_context>

<pallas_src>
import jax
import jax.numpy as jnp
from jax.experimental import pallas as pl
from jax.experimental.pallas import tpu as pltpu


def _round_up(x, m):
    return (x + m - 1) // m * m


def feature_embedding_kernel(inputs_ref, deltas_ref,
                             w_fr_ref, b_fr_ref,
                             w_td_ref, b_td_ref,
                             out_ref):
    # x = feature_reg(inputs)   (weight pre-transposed to (F, O) in prepare_params)
    x = jnp.dot(inputs_ref[...].astype(w_fr_ref.dtype), w_fr_ref[...],
                preferred_element_type=jnp.float32) + b_fr_ref[...]
    # gamma = exp(-relu(temporal_decay.linear(deltas)))
    w = jnp.dot(deltas_ref[...].astype(w_td_ref.dtype), w_td_ref[...],
                preferred_element_type=jnp.float32) + b_td_ref[...]
    gamma = jnp.exp(-jnp.maximum(w, 0.0))   # relu before exp: bounded even for
    out_ref[...] = (x * gamma).astype(out_ref.dtype)  # garbage rows in a ragged tile


def prepare_params(params, input_size, output_size, *, matmul_dtype=jnp.float32):
    """One-time weight prep (run outside the hot path): transpose torch
    nn.Linear weights (out, in) -> (in, out) for x @ W layout.  No lane
    padding: full-dim blocks are exempt from the (8,128) divisibility rule.
    matmul_dtype=jnp.bfloat16 is worthwhile on v5e (MXU is bf16-native there)."""
    def prep_w(w):
        return jnp.asarray(w, jnp.float32).T.astype(matmul_dtype)

    def prep_b(b):
        return jnp.asarray(b, jnp.float32).reshape(1, -1)

    return {
        "w_fr": prep_w(params["w_fr"]), "b_fr": prep_b(params["b_fr"]),
        "w_td": prep_w(params["w_td"]), "b_td": prep_b(params["b_td"]),
        "input_size": input_size, "output_size": output_size,
    }


def feature_embedding(inputs, deltas, prepped, *, tb_max=1024, out_dtype=jnp.float32):
    """inputs/deltas: [B, F] or [B, T, F]. prepped: from prepare_params()."""
    orig_shape = inputs.shape
    if inputs.ndim == 3:  # [batch, timesteps, features] -> flatten rows
        inputs = inputs.reshape(-1, orig_shape[-1])
        deltas = deltas.reshape(-1, orig_shape[-1])

    B, F = inputs.shape
    O = prepped["output_size"]
    assert F == prepped["input_size"]

    # Batch tile: multiple of 8 sublanes, at most tb_max rows per grid step.
    tb = min(_round_up(B, 8), tb_max)
    # Prefer >=2 grid steps when the batch allows it so the "parallel" axis can
    # shard across v7x's two TensorCores (no effect on v5e/v6e single-TC chips).
    if B > 8:
        tb = min(tb, _round_up(-(-B // 2), 8))

    grid = (pl.cdiv(B, tb),)  # ragged last block handled by Pallas (no padding)

    act_spec = pl.BlockSpec((tb, F), lambda i: (i, 0))
    w_spec = pl.BlockSpec((F, O), lambda i: (0, 0))   # DMA'd once, VMEM-resident
    b_spec = pl.BlockSpec((1, O), lambda i: (0, 0))   # DMA'd once, VMEM-resident
    out_spec = pl.BlockSpec((tb, O), lambda i: (i, 0))

    out = pl.pallas_call(
        feature_embedding_kernel,
        out_shape=jax.ShapeDtypeStruct((B, O), out_dtype),
        grid=grid,
        in_specs=[act_spec, act_spec, w_spec, b_spec, w_spec, b_spec],
        out_specs=out_spec,
        compiler_params=pltpu.CompilerParams(
            dimension_semantics=("parallel",),
        ),
    )(inputs.astype(jnp.float32), deltas.astype(jnp.float32),
      prepped["w_fr"], prepped["b_fr"], prepped["w_td"], prepped["b_td"])

    if len(orig_shape) == 3:
        out = out.reshape(orig_shape[0], orig_shape[1], O)
    return out


def _reference(inputs, deltas, params):
    x = inputs @ params["w_fr"].T + params["b_fr"]
    gamma = jnp.exp(-jax.nn.relu(deltas @ params["w_td"].T + params["b_td"]))
    return x * gamma


if __name__ == "__main__":
    F, O = 32, 32  # input features, output size
    key = jax.random.PRNGKey(0)
    ks = jax.random.split(key, 8)

    # Deterministic synthetic parameters (torch nn.Linear layout: weight (out, in)).
    params = {
        "w_fr": jax.random.normal(ks[0], (O, F), jnp.float32) * 0.1,
        "b_fr": jax.random.normal(ks[1], (O,), jnp.float32) * 0.1,
        "w_td": jax.random.normal(ks[2], (O, F), jnp.float32) * 0.1,
        "b_td": jax.random.normal(ks[3], (O,), jnp.float32) * 0.1,
    }
    prepped = prepare_params(params, F, O)  # one-time weight prep

    # Case 1: 2-D [batch, features]
    B = 8
    inputs2 = jax.random.normal(ks[4], (B, F), jnp.float32)
    deltas2 = jnp.abs(jax.random.normal(ks[5], (B, F), jnp.float32))
    out2 = jax.block_until_ready(feature_embedding(inputs2, deltas2, prepped))
    ref2 = _reference(inputs2, deltas2, params)
    assert out2.shape == (B, O)
    assert jnp.allclose(out2, ref2, atol=1e-5, rtol=1e-5), "2D mismatch vs reference"

    # Case 2: 3-D [batch, timesteps, features] (exercises the ragged last block)
    Bt, T = 2, 12
    inputs3 = jax.random.normal(ks[6], (Bt, T, F), jnp.float32)
    deltas3 = jnp.abs(jax.random.normal(ks[7], (Bt, T, F), jnp.float32))
    out3 = jax.block_until_ready(feature_embedding(inputs3, deltas3, prepped))
    ref3 = _reference(inputs3, deltas3, params)
    assert out3.shape == (Bt, T, O)
    assert jnp.allclose(out3, ref3, atol=1e-5, rtol=1e-5), "3D mismatch vs reference"

    print("KERNEL_OK")
</pallas_src>

<mosaic_0001>
module attributes {stable_mosaic.version = 11 : i64} {
  func.func @feature_embedding_kernel(%arg0: i32, %arg1: memref<8x32xf32, #tpu.memory_space<vmem>>, %arg2: memref<8x32xf32, #tpu.memory_space<vmem>>, %arg3: memref<32x32xf32, #tpu.memory_space<vmem>>, %arg4: memref<1x32xf32, #tpu.memory_space<vmem>>, %arg5: memref<32x32xf32, #tpu.memory_space<vmem>>, %arg6: memref<1x32xf32, #tpu.memory_space<vmem>>, %arg7: memref<8x32xf32, #tpu.memory_space<vmem>>) attributes {dimension_semantics = [#tpu.dimension_semantics<parallel>], iteration_bounds = array<i64: 1>, scalar_prefetch = 0 : i64, scratch_operands = 0 : i64, tpu.core_type = #tpu.core_type<tc>, window_params = [{transform_indices = @transform_0, window_bounds = array<i64: 8, 32>}, {transform_indices = @transform_1, window_bounds = array<i64: 8, 32>}, {pipeline_mode = #tpu.pipeline_mode<synchronous>, transform_indices = @transform_2, window_bounds = array<i64: 32, 32>}, {pipeline_mode = #tpu.pipeline_mode<synchronous>, transform_indices = @transform_3, window_bounds = array<i64: 1, 32>}, {pipeline_mode = #tpu.pipeline_mode<synchronous>, transform_indices = @transform_4, window_bounds = array<i64: 32, 32>}, {pipeline_mode = #tpu.pipeline_mode<synchronous>, transform_indices = @transform_5, window_bounds = array<i64: 1, 32>}, {transform_indices = @transform_6, window_bounds = array<i64: 8, 32>}]} {
    %c0 = arith.constant 0 : index
    %c0_0 = arith.constant 0 : index
    %0 = vector.load %arg1[%c0, %c0_0] : memref<8x32xf32, #tpu.memory_space<vmem>>, vector<8x32xf32>
    %c0_1 = arith.constant 0 : index
    %c0_2 = arith.constant 0 : index
    %1 = vector.load %arg3[%c0_1, %c0_2] : memref<32x32xf32, #tpu.memory_space<vmem>>, vector<32x32xf32>
    %cst = arith.constant dense<0.000000e+00> : vector<8x32xf32>
    %2 = tpu.matmul %0, %1, %cst {dimension_numbers = #tpu.dot_dimension_numbers<[1], [0], [0], [1], [0, 0, 1, 1], [], []>} : vector<8x32xf32>, vector<32x32xf32>, vector<8x32xf32> -> vector<8x32xf32>
    %c0_3 = arith.constant 0 : index
    %c0_4 = arith.constant 0 : index
    %3 = vector.load %arg4[%c0_3, %c0_4] : memref<1x32xf32, #tpu.memory_space<vmem>>, vector<1x32xf32>
    %4 = vector.broadcast %3 : vector<1x32xf32> to vector<8x32xf32>
    %5 = arith.addf %2, %4 : vector<8x32xf32>
    %c0_5 = arith.constant 0 : index
    %c0_6 = arith.constant 0 : index
    %6 = vector.load %arg2[%c0_5, %c0_6] : memref<8x32xf32, #tpu.memory_space<vmem>>, vector<8x32xf32>
    %c0_7 = arith.constant 0 : index
    %c0_8 = arith.constant 0 : index
    %7 = vector.load %arg5[%c0_7, %c0_8] : memref<32x32xf32, #tpu.memory_space<vmem>>, vector<32x32xf32>
    %cst_9 = arith.constant dense<0.000000e+00> : vector<8x32xf32>
    %8 = tpu.matmul %6, %7, %cst_9 {dimension_numbers = #tpu.dot_dimension_numbers<[1], [0], [0], [1], [0, 0, 1, 1], [], []>} : vector<8x32xf32>, vector<32x32xf32>, vector<8x32xf32> -> vector<8x32xf32>
    %c0_10 = arith.constant 0 : index
    %c0_11 = arith.constant 0 : index
    %9 = vector.load %arg6[%c0_10, %c0_11] : memref<1x32xf32, #tpu.memory_space<vmem>>, vector<1x32xf32>
    %10 = vector.broadcast %9 : vector<1x32xf32> to vector<8x32xf32>
    %11 = arith.addf %8, %10 : vector<8x32xf32>
    %cst_12 = arith.constant 0.000000e+00 : f32
    %12 = vector.broadcast %cst_12 : f32 to vector<8x32xf32>
    %13 = arith.maximumf %11, %12 : vector<8x32xf32>
    %cst_13 = arith.constant 0.000000e+00 : f32
    %14 = vector.broadcast %cst_13 : f32 to vector<8x32xf32>
    %15 = arith.subf %14, %13 : vector<8x32xf32>
    %16 = math.exp %15 : vector<8x32xf32>
    %17 = arith.mulf %5, %16 : vector<8x32xf32>
    %c0_14 = arith.constant 0 : index
    %c0_15 = arith.constant 0 : index
    %18 = vector.load %arg7[%c0_14, %c0_15] : memref<8x32xf32, #tpu.memory_space<vmem>>, vector<8x32xf32>
    tpu.vector_store %arg7[%c0_14, %c0_15], %17 {strides = array<i32>} : memref<8x32xf32, #tpu.memory_space<vmem>>, vector<8x32xf32>,
    return
  }
  func.func @transform_0(%arg0: i32) -> (i32, i32) {
    %c0_i32 = arith.constant 0 : i32
    %c0_i32_0 = arith.constant 0 : i32
    return %arg0, %c0_i32 : i32, i32
  }
  func.func @transform_1(%arg0: i32) -> (i32, i32) {
    %c0_i32 = arith.constant 0 : i32
    %c0_i32_0 = arith.constant 0 : i32
    return %arg0, %c0_i32 : i32, i32
  }
  func.func @transform_2(%arg0: i32) -> (i32, i32) {
    %c0_i32 = arith.constant 0 : i32
    %c0_i32_0 = arith.constant 0 : i32
    %c0_i32_1 = arith.constant 0 : i32
    return %c0_i32, %c0_i32_0 : i32, i32
  }
  func.func @transform_3(%arg0: i32) -> (i32, i32) {
    %c0_i32 = arith.constant 0 : i32
    %c0_i32_0 = arith.constant 0 : i32
    %c0_i32_1 = arith.constant 0 : i32
    return %c0_i32, %c0_i32_0 : i32, i32
  }
  func.func @transform_4(%arg0: i32) -> (i32, i32) {
    %c0_i32 = arith.constant 0 : i32
    %c0_i32_0 = arith.constant 0 : i32
    %c0_i32_1 = arith.constant 0 : i32
    return %c0_i32, %c0_i32_0 : i32, i32
  }
  func.func @transform_5(%arg0: i32) -> (i32, i32) {
    %c0_i32 = arith.constant 0 : i32
    %c0_i32_0 = arith.constant 0 : i32
    %c0_i32_1 = arith.constant 0 : i32
    return %c0_i32, %c0_i32_0 : i32, i32
  }
  func.func @transform_6(%arg0: i32) -> (i32, i32) {
    %c0_i32 = arith.constant 0 : i32
    %c0_i32_0 = arith.constant 0 : i32
    return %arg0, %c0_i32 : i32, i32
  }
}

</mosaic_0001>

<bundles_post_ra>
// kernel: tpu_custom_call.1
= control target key start
LH: loop header
LB: loop body
LE: loop exit
PB: predicated region body
PF: predicated region fallthrough
CT: control target
= control target key end

     0   :  { %11 = vsyncpa [#allocation3], 0  ;;  %s561_s0 = inlined_call_operand.hbm [shape: f32[8,32], index: 0, kind: input, shape index: {}]   ;;  %s562_s1 = inlined_call_operand.hbm [shape: f32[8,32], index: 1, kind: input, shape index: {}]   ;;  %s563_s2 = inlined_call_operand.hbm [shape: f32[32,32], index: 2, kind: input, shape index: {}]   ;;  %s564_s3 = inlined_call_operand.vmem [shape: f32[1,32], index: 3, kind: input, shape index: {}]   ;;  %s565_s4 = inlined_call_operand.hbm [shape: f32[32,32], index: 4, kind: input, shape index: {}]   ;;  %s566_s5 = inlined_call_operand.vmem [shape: f32[1,32], index: 5, kind: input, shape index: {}]   ;;  %s567_s6 = inlined_call_operand.hbm [shape: f32[8,32], index: 6, kind: output, shape index: {}]  }
   0x1   :  { %12 = vsyncpa [#allocation6], 0 }
   0x2   :  { %13 = vsyncpa [#allocation9], 0 }
   0x3   :  { %14 = vsyncpa [#allocation4], 0  ;;  %s447_s21 = smov [#allocation5]   ;;  %s448_s23 = smov [#allocation2]  }
   0x4   :  { %s31_s22 = sshll.u32 %s447_s21, 4  ;;  %s21_s24 = sshll.u32 %s448_s23, 4  ;;  %s32_s22 = int_to_ptr.vmem [resolvable:$true] %s31_s22  ;;  %s22_s24 = int_to_ptr.vmem [resolvable:$true] %s21_s24 }
   0x5   :  { %s329_s27 = scalar_lea.hbm %s562_s1, 128 }
   0x6   :  { %p330_p0 = scmp.ne.s32.totalorder %s562_s1, %s329_s27  ;;  %p333_p1 = scmp.lt.u32.totalorder %s329_s27, %s562_s1 }
   0x8   :  { %p335_p2 = pnand %p333_p1, %p330_p0 }
   0xa   :  { %338 = shalt.err (!%p335_p2)
}
   0xb   :  { %s339_s8 = scalar_lea.vmem %s32_s22, 128  ;;  %p344_p4 = scmp.lt.s32.totalorder %s32_s22, %s32_s22 }
   0xc   :  { %p340_p3 = scmp.ne.s32.totalorder %s32_s22, %s339_s8  ;;  %p345_p5 = scmp.lt.s32.totalorder %s339_s8, %s339_s8 }
   0xe   :  { %p346_p6 = por %p345_p5, %p344_p4 }
  0x10   :  { %p347_p7 = pnand %p346_p6, %p340_p3 }
  0x12   :  { %350 = shalt.err (!%p347_p7)
}
  0x13   :  { %34 = dma.hbm_to_vmem [thread:$0]  %s562_s1, 128, %s32_s22, [#allocation6]  }
  0x14   :  { %s351_s13 = scalar_lea.hbm %s561_s0, 128 }
  0x15   :  { %p352_p8 = scmp.ne.s32.totalorder %s561_s0, %s351_s13  ;;  %p355_p9 = scmp.lt.u32.totalorder %s351_s13, %s561_s0 }
  0x17   :  { %p357_p10 = pnand %p355_p9, %p352_p8 }
  0x19   :  { %360 = shalt.err (!%p357_p10)
}
  0x1a   :  { %s361_s18 = scalar_lea.vmem %s22_s24, 128  ;;  %p366_p12 = scmp.lt.s32.totalorder %s22_s24, %s22_s24 }
  0x1b   :  { %p362_p11 = scmp.ne.s32.totalorder %s22_s24, %s361_s18  ;;  %p367_p13 = scmp.lt.s32.totalorder %s361_s18, %s361_s18 }
  0x1d   :  { %p368_p0 = por %p367_p13, %p366_p12 }
  0x1f   :  { %p369_p1 = pnand %p368_p0, %p362_p11 }
  0x21   :  { %372 = shalt.err (!%p369_p1)
}
  0x22   :  { %24 = dma.hbm_to_vmem [thread:$0]  %s561_s0, 128, %s22_s24, [#allocation3]  }
  0x23   :  { %s449_s20 = smov [#allocation7]   ;;  %s373_s25 = scalar_lea.hbm %s563_s2, 512 }
  0x24   :  { %s40_s21 = sshll.u32 %s449_s20, 4  ;;  %p374_p2 = scmp.ne.s32.totalorder %s563_s2, %s373_s25  ;;  %s41_s21 = int_to_ptr.vmem [resolvable:$true] %s40_s21 }
  0x25   :  { %p377_p3 = scmp.lt.u32.totalorder %s373_s25, %s563_s2 }
  0x27   :  { %p379_p4 = pnand %p377_p3, %p374_p2 }
  0x29   :  { %382 = shalt.err (!%p379_p4)
}
  0x2a   :  { %s383_s30 = scalar_lea.vmem %s41_s21, 512  ;;  %p388_p6 = scmp.lt.s32.totalorder %s41_s21, %s41_s21 }
  0x2b   :  { %p384_p5 = scmp.ne.s32.totalorder %s41_s21, %s383_s30  ;;  %p389_p7 = scmp.lt.s32.totalorder %s383_s30, %s383_s30 }
  0x2d   :  { %p390_p8 = por %p389_p7, %p388_p6 }
  0x2f   :  { %p391_p9 = pnand %p390_p8, %p384_p5 }
  0x31   :  { %394 = shalt.err (!%p391_p9)
}
  0x32   :  { %s450_s0 = smov 128   ;;  %s451_s24 = smov 8  }
  0x33   :  { %46 = dma.hbm_to_vmem [thread:$0]  %s563_s2, 512, %s41_s21, [#allocation6], %s450_s0, %s450_s0, %s451_s24  }
  0x34   :  { %s452_s9 = smov [#allocation8]   ;;  %s395_s13 = scalar_lea.hbm %s565_s4, 512 }
  0x35   :  { %s54_s10 = sshll.u32 %s452_s9, 4  ;;  %p396_p10 = scmp.ne.s32.totalorder %s565_s4, %s395_s13  ;;  %s55_s10 = int_to_ptr.vmem [resolvable:$true] %s54_s10 }
  0x36   :  { %p399_p11 = scmp.lt.u32.totalorder %s395_s13, %s565_s4 }
  0x38   :  { %p401_p12 = pnand %p399_p11, %p396_p10 }
  0x3a   :  { %404 = shalt.err (!%p401_p12)
}
  0x3b   :  { %s405_s18 = scalar_lea.vmem %s55_s10, 512  ;;  %p410_p0 = scmp.lt.s32.totalorder %s55_s10, %s55_s10 }
  0x3c   :  { %p406_p13 = scmp.ne.s32.totalorder %s55_s10, %s405_s18  ;;  %p411_p1 = scmp.lt.s32.totalorder %s405_s18, %s405_s18 }
  0x3e   :  { %p412_p2 = por %p411_p1, %p410_p0 }
  0x40   :  { %p413_p3 = pnand %p412_p2, %p406_p13 }
  0x42   :  { %416 = shalt.err (!%p413_p3)
}
  0x43   :  { %60 = dma.hbm_to_vmem [thread:$0]  %s565_s4, 512, %s55_s10, [#allocation9], %s450_s0, %s450_s0, %s451_s24  }
  0x44   :  { %439 = dma.done.wait [#allocation3], 128  }
  0x45   :  { %440 = vsyncadd [#allocation3], 4294967168 }
  0x46   :  { %441 = dma.done.wait [#allocation6], 640  }
  0x47   :  { %442 = vsyncadd [#allocation6], 4294966656 }
  0x48   :  { %443 = dma.done.wait [#allocation9], 512  }
  0x49   :  { %444 = vsyncadd [#allocation9], 4294966784  ;;  %v453_v0 = vmov 0.0|0.0   ;;  %vm454_vm0 = vmmov 0   ;;  %v455_v1 = vmov 0.0   ;;  %v162_v2 = vld [vmem:[#allocation8] sm:$0xff] }
  0x4a   :  { %311 = vmatprep.subr.bf16.mxu1 %v453_v0  ;;  %302 = vmatprep.mubr.msk.f32.mxu1 %vm454_vm0, %v455_v1  ;;  %v163_v3 = vld [vmem:[#allocation8 + $0x8] sm:$0xff]  ;;  %v164_v4 = vld [vmem:[#allocation8 + $0x10] sm:$0xff]  ;;  %v165_v6 = vld [vmem:[#allocation8 + $0x18] sm:$0xff]  ;;  %vm87_vm1 = vcmask 261120   ;;  %s456_s22 = smov [#allocation10]  }
  0x4b   :  { %305 = vmatprep.subr.bf16.mxu0 %v453_v0  ;;  %291 = vmatprep.mubr.msk.f32.mxu0 %vm454_vm0, %v455_v1  ;;  %v312_v5 = vpack.c.bf16 %v163_v3, %v162_v2  ;;  %v76_v7 = vld [vmem:[#allocation7] sm:$0xff]  ;;  %v77_v8 = vld [vmem:[#allocation7 + $0x8] sm:$0xff]  ;;  %v78_v9 = vld [vmem:[#allocation7 + $0x10] sm:$0xff]  ;;  %v315_v11 = vpack.c.bf16 %v165_v6, %v164_v4  ;;  %s258_s23 = sshll.u32 %s456_s22, 4  ;;  %s259_s23 = int_to_ptr.vmem [resolvable:$true] %s258_s23 }
  0x4c   :  { %v79_v10 = vld [vmem:[#allocation7 + $0x18] sm:$0xff]  ;;  %v306_v12 = vpack.c.bf16 %v77_v8, %v76_v7  ;;  %v75_v15 = vld [vmem:[#allocation2] sm:$0xff]  ;;  %p422_p5 = scmp.lt.s32.totalorder %s259_s23, %s259_s23 }
  0x4d   :  { %313 = vmatpush3.bf16.msra.mxu1 %v312_v5  ;;  %v309_v13 = vpack.c.bf16 %v79_v10, %v78_v9  ;;  %v161_v14 = vld [vmem:[#allocation5] sm:$0xff]  ;;  %v271_v16 = vld [vmem:[%s566_s5] ss:$0 sm:$0xff]  ;;  %s417_s5 = scalar_lea.vmem %s259_s23, 128 }
  0x4e   :  { %314 = vmatprep.subr.bf16.mxu1 %v453_v0  ;;  %307 = vmatpush3.bf16.msra.mxu0 %v306_v12  ;;  %v269_v25 = vld [vmem:[%s564_s3] ss:$0 sm:$0xff]  ;;  %p418_p4 = scmp.ne.s32.totalorder %s259_s23, %s417_s5  ;;  %p423_p6 = scmp.lt.s32.totalorder %s417_s5, %s417_s5 }
  0x4f   :  { %308 = vmatprep.subr.bf16.mxu0 %v453_v0 }
  0x50   :  { %p424_p7 = por %p423_p6, %p422_p5 }
  0x51   :  { %316 = vmatpush3.bf16.msra.mxu1 %v315_v11 }
  0x52   :  { %310 = vmatpush3.bf16.msra.mxu0 %v309_v13  ;;  %p425_p8 = pnand %p424_p7, %p418_p4 }
  0x54   :  { %303 = vmatmul.mubr.msk.f32.vlgmr.msra.gmra.mrb[0].mxu1 %vm87_vm1, %v161_v14 }
  0x55   :  { %292 = vmatmul.mubr.msk.f32.vlgmr.msra.gmra.mrb[0].mxu0 %vm87_vm1, %v75_v15 }
 0x127   :  { %v242_v17 = vpop.f32.mrb[0].mxu1 }
 0x128   :  { %v243_v18 = vadd.f32 %v271_v16, %v242_v17  ;;  %v304_v19 = vpop.f32.mrb[1].mxu1  ;;  %v157_v20 = vpop.f32.mrb[0].mxu0 }
 0x129   :  { %v293_v22 = vpop.f32.mrb[1].mxu0  ;;  %v158_v26 = vadd.f32 %v269_v25, %v157_v20 }
 0x12a   :  { %v246_v21 = vmax.f32 %v243_v18, 0.0 }
 0x12c   :  { %v247_v23 = vsub.f32 0.0, %v246_v21 }
 0x12e   :  { %v248_v24 = vmul.f32 1.442695, %v247_v23 }
 0x130   :  { %327 = vpow2.f32 %v248_v24 }
 0x13a   :  { %v328_v27 = vpop.eup %327 }
 0x13b   :  { %v250_v28 = vmul.f32 %v328_v27, %v158_v26 }
 0x13d   :  { %251 = vst.msk [vmem:[#allocation10] sm:$0xff] %vm87_vm1, %v250_v28 }
 0x13e   :  { %428 = shalt.err (!%p425_p8)
}
 0x13f   :  { %s429_s27 = scalar_lea.hbm %s567_s6, 128 }
 0x140   :  { %p430_p9 = scmp.ne.s32.totalorder %s567_s6, %s429_s27  ;;  %p433_p10 = scmp.lt.u32.totalorder %s429_s27, %s567_s6 }
 0x142   :  { %p435_p11 = pnand %p433_p10, %p430_p9 }
 0x144   :  { %438 = shalt.err (!%p435_p11)
}
 0x145   :  { %261 = dma.vmem_to_hbm [thread:$0]  %s259_s23, 128, %s567_s6, [#allocation4]  }
 0x146   :  { %445 = dma.done.wait [#allocation4], 128  }
 0x147   :  { %446 = vsyncadd [#allocation4], 4294967168 }
 0x148   :  { %265 = vsyncpa [#allocation3], 1 }
 0x149   :  { %266 = vsyncpa [#allocation6], 1 }
 0x14a   :  { %267 = vsyncpa [#allocation9], 1 }
 0x14b   :  { %268 = vsyncpa [#allocation4], 1 }

</bundles_post_ra>
